<compile_context>
chip_gen: v5e
topology: v5e:2x2
jax: 0.10.0
libtpu: 0.0.40
codegen_flags: <defaults>
</compile_context>

<pallas_src>
import functools

import jax
import jax.numpy as jnp
from jax.experimental import pallas as pl
from jax.experimental.pallas import tpu as pltpu


# ----------------------------------------------------------------------------
# Fused kernel: in-kernel embedding gather -> reversed tanh-RNN scan -> fc -> softmax
# ----------------------------------------------------------------------------
def _fused_rnn_kernel(ids_ref, slab_ref, out_ref, xp_ref, *,
                      seq_len, batch, batch_pad, hidden, n_cls, reverse,
                      whh_off, wfc_off, bfc_off):
    # ids_ref:  (B, T)  int32 token ids in SMEM (scalar prefetch)
    # slab_ref: (R, H)  packed params in VMEM:
    #             rows [0, V)             pre-projected embedding table (E@W_ih^T + b)
    #             rows [whh_off, +H)      W_hh^T
    #             rows [wfc_off, +H)      W_fc^T, zero-padded columns beyond C
    #             row  [bfc_off]          fc bias, padded columns hold -1e30
    # out_ref:  (B, C)  softmax probabilities
    # xp_ref:   (T*BP, H) VMEM scratch: gathered, batch-padded, time-major inputs
    T, B, BP, H, C = seq_len, batch, batch_pad, hidden, n_cls

    # Zero the padded scratch once so pad-batch rows stay at exactly zero.
    xp_ref[...] = jnp.zeros_like(xp_ref)

    # In-kernel embedding gather: T*B independent single-row dynamic loads from the
    # pre-projected table, stored into sublane-tile-aligned (BP, H) blocks.  These do
    # not depend on the recurrence state, so they stay off the serial critical path.
    for t in range(T):
        for b in range(B):
            tok = ids_ref[b, t]
            xp_ref[pl.ds(t * BP + b, 1), :] = slab_ref[pl.ds(tok, 1), :]

    whh_t = slab_ref[pl.ds(whh_off, H), :]                      # (H, H), hoisted load

    # Serial tanh recurrence over the selected (backward) direction, fully unrolled
    # (T is static and small); only the h-dependent matmul + add + tanh is serial.
    # TODO(synk): could hold W_hh resident in the MXU via pltpu.matmul_push_rhs /
    # matmul_acc_lhs / matmul_pop to shave per-step weight-load latency; plain
    # jnp.dot is kept for portability across v5e/v6e/v7x.
    h = jnp.zeros((BP, H), jnp.float32)
    for i in range(T):
        t = (T - 1 - i) if reverse else i                       # static index
        x_t = xp_ref[pl.ds(t * BP, BP), :]                      # aligned (BP, H) tile
        h = jnp.tanh(x_t + jnp.dot(h, whh_t, preferred_element_type=jnp.float32))

    # fc + softmax epilogue.  W_fc^T columns beyond C are zero and the corresponding
    # bias entries are -1e30, so the softmax over the full (padded) width is exact
    # for the real classes and exactly 0 for the pads.
    wfc_t = slab_ref[pl.ds(wfc_off, H), :]                      # (H, H)
    bfc = slab_ref[pl.ds(bfc_off, 1), :]                        # (1, H)
    logits = jnp.dot(h, wfc_t, preferred_element_type=jnp.float32) + bfc
    m = jnp.max(logits, axis=1, keepdims=True)
    e = jnp.exp(logits - m)
    probs = e / jnp.sum(e, axis=1, keepdims=True)               # (BP, H)
    out_ref[...] = probs[:B, :C]


# ----------------------------------------------------------------------------
# One-time parameter prep (load time): DCE to the live direction, pre-project the
# embedding table, pack everything into a single lane/sublane-aligned slab.
# ----------------------------------------------------------------------------
def prepare_params(params, *, num_layers, bidirectional):
    num_dirs = 2 if bidirectional else 1
    n_rows = num_layers * num_dirs
    sel = n_rows - 3                      # h_n row selected by output[-3]
    assert sel >= 0, "module requires num_layers*num_dirs >= 3"
    sel_layer, sel_dir = sel // num_dirs, sel % num_dirs
    if sel_layer != 0:
        # TODO(synk): only the layer-0 fast path is implemented (true for the module's
        # num_layers=2, bidirectional=True config); deeper selections would need the
        # earlier layers' full output sequences.
        raise NotImplementedError("selected h_n row must belong to layer 0")

    w_ih, w_hh, b_ih, b_hh = params["rnn"][(sel_layer, sel_dir)]
    emb = params["embeddings"].astype(jnp.float32)
    fc_w = params["fc_w"].astype(jnp.float32)
    fc_b = params["fc_b"].astype(jnp.float32)
    V = emb.shape[0]
    H = w_hh.shape[0]
    C = fc_w.shape[0]
    assert H % 8 == 0 and C <= H, "packed slab assumes H % 8 == 0 and C <= H"

    # lookup(x) @ W_ih^T + b  ==  (E @ W_ih^T + b)[x]  -> do it once over the vocab.
    table = emb @ w_ih.astype(jnp.float32).T + (b_ih + b_hh).astype(jnp.float32)[None, :]

    v_pad = -(-V // 8) * 8
    table_p = jnp.zeros((v_pad, H), jnp.float32).at[:V].set(table)          # (Vp, H)
    whh_t = w_hh.astype(jnp.float32).T                                      # (H, H)
    wfc_t_p = jnp.zeros((H, H), jnp.float32).at[:, :C].set(fc_w.T)          # (H, H)
    bfc_row = jnp.full((1, H), -1e30, jnp.float32).at[0, :C].set(fc_b)      # (1, H)
    bfc_p = jnp.concatenate([bfc_row, jnp.zeros((7, H), jnp.float32)], 0)   # (8, H)

    slab = jnp.concatenate([table_p, whh_t, wfc_t_p, bfc_p], axis=0)        # (Vp+2H+8, H)
    return {
        "slab": slab,
        "reverse": sel_dir == 1,
        "hidden": H,
        "num_classes": C,
        "whh_off": v_pad,
        "wfc_off": v_pad + H,
        "bfc_off": v_pad + 2 * H,
    }


# ----------------------------------------------------------------------------
# Forward pass: one pallas_call, one packed VMEM operand, ids via scalar prefetch.
# ----------------------------------------------------------------------------
def intent_cls_rnn_forward(x_ids, prepped, *, batch_pad=8):
    B, T = x_ids.shape
    H = prepped["hidden"]
    C = prepped["num_classes"]
    slab = prepped["slab"]
    if x_ids.dtype != jnp.int32:
        x_ids = x_ids.astype(jnp.int32)

    kernel = functools.partial(
        _fused_rnn_kernel,
        seq_len=T, batch=B, batch_pad=batch_pad, hidden=H, n_cls=C,
        reverse=prepped["reverse"],
        whh_off=prepped["whh_off"], wfc_off=prepped["wfc_off"],
        bfc_off=prepped["bfc_off"])

    # TODO(synk): single-point grid is optimal at this toy size; if B/T ever scale,
    # add a leading "parallel" grid axis over batch blocks so v7x's second TensorCore
    # is used.
    return pl.pallas_call(
        kernel,
        out_shape=jax.ShapeDtypeStruct((B, C), jnp.float32),
        grid_spec=pltpu.PrefetchScalarGridSpec(
            num_scalar_prefetch=1,                                  # x_ids -> SMEM
            grid=(1,),
            in_specs=[pl.BlockSpec(slab.shape, lambda i, ids: (0, 0))],
            out_specs=pl.BlockSpec((B, C), lambda i, ids: (0, 0)),
            scratch_shapes=[pltpu.VMEM((T * batch_pad, H), jnp.float32)],
        ),
        compiler_params=pltpu.CompilerParams(dimension_semantics=("arbitrary",)),
    )(x_ids, slab)


# ----------------------------------------------------------------------------
# Pure-JAX reference: the FULL model (all layers / directions), exactly mirroring the
# PyTorch forward.  Used to check the DCE'd fused kernel against the whole module.
# ----------------------------------------------------------------------------
def _rnn_dir_ref(x_tbd, w_ih, w_hh, b_ih, b_hh, reverse):
    T, B, _ = x_tbd.shape
    H = w_hh.shape[0]
    xs = x_tbd[::-1] if reverse else x_tbd

    def step(h, x_t):
        h_new = jnp.tanh(x_t @ w_ih.T + b_ih + h @ w_hh.T + b_hh)
        return h_new, h_new

    h_last, ys = jax.lax.scan(step, jnp.zeros((B, H), jnp.float32), xs)
    ys = ys[::-1] if reverse else ys
    return ys, h_last


def _forward_ref(x_ids, params, *, num_layers, bidirectional):
    num_dirs = 2 if bidirectional else 1
    emb = params["embeddings"][x_ids]
    layer_in = jnp.transpose(emb, (1, 0, 2))
    h_rows = []
    for l in range(num_layers):
        outs = []
        for d in range(num_dirs):
            w_ih, w_hh, b_ih, b_hh = params["rnn"][(l, d)]
            y, h = _rnn_dir_ref(layer_in, w_ih, w_hh, b_ih, b_hh, reverse=(d == 1))
            outs.append(y)
            h_rows.append(h)
        layer_in = jnp.concatenate(outs, axis=-1)
    h_n = jnp.stack(h_rows)                               # (L*D, B, H)
    out_all = h_n @ params["fc_w"].T + params["fc_b"]     # (L*D, B, C)
    return jax.nn.softmax(out_all[-3], axis=1)


# ----------------------------------------------------------------------------
# Main
# ----------------------------------------------------------------------------
if __name__ == "__main__":
    VOCAB, EMB_DIM, HIDDEN, SEQ, BATCH, NUM_CLASSES = 50, 32, 32, 8, 2, 8
    NUM_LAYERS, BIDIRECTIONAL = 2, True
    NUM_DIRS = 2 if BIDIRECTIONAL else 1

    key = jax.random.PRNGKey(0)
    keys = iter(jax.random.split(key, 32))

    params = {
        "embeddings": 0.1 * jax.random.normal(next(keys), (VOCAB, EMB_DIM), jnp.float32),
        "fc_w": 0.1 * jax.random.normal(next(keys), (NUM_CLASSES, HIDDEN), jnp.float32),
        "fc_b": 0.1 * jax.random.normal(next(keys), (NUM_CLASSES,), jnp.float32),
        "rnn": {},
    }
    for l in range(NUM_LAYERS):
        in_dim = EMB_DIM if l == 0 else NUM_DIRS * HIDDEN
        for d in range(NUM_DIRS):
            params["rnn"][(l, d)] = (
                0.1 * jax.random.normal(next(keys), (HIDDEN, in_dim), jnp.float32),  # W_ih
                0.1 * jax.random.normal(next(keys), (HIDDEN, HIDDEN), jnp.float32),  # W_hh
                0.1 * jax.random.normal(next(keys), (HIDDEN,), jnp.float32),         # b_ih
                0.1 * jax.random.normal(next(keys), (HIDDEN,), jnp.float32),         # b_hh
            )

    x = jax.random.randint(next(keys), (BATCH, SEQ), 0, VOCAB, dtype=jnp.int32)

    # One-time parameter layout prep (not on the per-call forward path).
    prepped = jax.tree_util.tree_map(jax.block_until_ready,
                                     prepare_params(params,
                                                    num_layers=NUM_LAYERS,
                                                    bidirectional=BIDIRECTIONAL))

    out = intent_cls_rnn_forward(x, prepped)
    out = jax.block_until_ready(out)

    ref = _forward_ref(x, params, num_layers=NUM_LAYERS, bidirectional=BIDIRECTIONAL)
    assert out.shape == (BATCH, NUM_CLASSES)
    assert jnp.allclose(out, ref, atol=1e-5, rtol=1e-5), "mismatch vs full-model reference"
    assert jnp.allclose(jnp.sum(out, axis=1), 1.0, atol=1e-5), "softmax rows must sum to 1"

    print("KERNEL_OK")
</pallas_src>

<mosaic_0001>
module attributes {stable_mosaic.version = 11 : i64} {
  func.func @_fused_rnn_kernel(%arg0: i32, %arg1: memref<2x8xi32, #tpu.memory_space<smem>>, %arg2: memref<128x32xf32, #tpu.memory_space<vmem>>, %arg3: memref<2x8xf32, #tpu.memory_space<vmem>>, %arg4: memref<64x32xf32, #tpu.memory_space<vmem>>) attributes {dimension_semantics = [#tpu.dimension_semantics<arbitrary>], iteration_bounds = array<i64: 1>, scalar_prefetch = 1 : i64, scratch_operands = 1 : i64, tpu.core_type = #tpu.core_type<tc>, window_params = [{pipeline_mode = #tpu.pipeline_mode<synchronous>, transform_indices = @transform_0, window_bounds = array<i64: 128, 32>}, {pipeline_mode = #tpu.pipeline_mode<synchronous>, transform_indices = @transform_1, window_bounds = array<i64: 2, 8>}]} {
    %cst = arith.constant 0.000000e+00 : f32
    %0 = vector.broadcast %cst : f32 to vector<64x32xf32>
    %c0 = arith.constant 0 : index
    %c0_0 = arith.constant 0 : index
    %1 = vector.load %arg4[%c0, %c0_0] : memref<64x32xf32, #tpu.memory_space<vmem>>, vector<64x32xf32>
    tpu.vector_store %arg4[%c0, %c0_0], %0 {strides = array<i32>} : memref<64x32xf32, #tpu.memory_space<vmem>>, vector<64x32xf32>,
    %c0_1 = arith.constant 0 : index
    %c0_2 = arith.constant 0 : index
    %2 = memref.load %arg1[%c0_1, %c0_2] : memref<2x8xi32, #tpu.memory_space<smem>>
    %3 = arith.index_cast %2 : i32 to index
    %c0_3 = arith.constant 0 : index
    %4 = vector.load %arg2[%3, %c0_3] : memref<128x32xf32, #tpu.memory_space<vmem>>, vector<1x32xf32>
    %c0_4 = arith.constant 0 : index
    %c0_5 = arith.constant 0 : index
    %5 = vector.load %arg4[%c0_4, %c0_5] : memref<64x32xf32, #tpu.memory_space<vmem>>, vector<1x32xf32>
    tpu.vector_store %arg4[%c0_4, %c0_5], %4 {strides = array<i32>} : memref<64x32xf32, #tpu.memory_space<vmem>>, vector<1x32xf32>,
    %c1 = arith.constant 1 : index
    %c0_6 = arith.constant 0 : index
    %6 = memref.load %arg1[%c1, %c0_6] : memref<2x8xi32, #tpu.memory_space<smem>>
    %7 = arith.index_cast %6 : i32 to index
    %c0_7 = arith.constant 0 : index
    %8 = vector.load %arg2[%7, %c0_7] : memref<128x32xf32, #tpu.memory_space<vmem>>, vector<1x32xf32>
    %c1_8 = arith.constant 1 : index
    %c0_9 = arith.constant 0 : index
    %9 = vector.load %arg4[%c1_8, %c0_9] : memref<64x32xf32, #tpu.memory_space<vmem>>, vector<1x32xf32>
    tpu.vector_store %arg4[%c1_8, %c0_9], %8 {strides = array<i32>} : memref<64x32xf32, #tpu.memory_space<vmem>>, vector<1x32xf32>,
    %c0_10 = arith.constant 0 : index
    %c1_11 = arith.constant 1 : index
    %10 = memref.load %arg1[%c0_10, %c1_11] : memref<2x8xi32, #tpu.memory_space<smem>>
    %11 = arith.index_cast %10 : i32 to index
    %c0_12 = arith.constant 0 : index
    %12 = vector.load %arg2[%11, %c0_12] : memref<128x32xf32, #tpu.memory_space<vmem>>, vector<1x32xf32>
    %c8 = arith.constant 8 : index
    %c0_13 = arith.constant 0 : index
    %13 = vector.load %arg4[%c8, %c0_13] : memref<64x32xf32, #tpu.memory_space<vmem>>, vector<1x32xf32>
    tpu.vector_store %arg4[%c8, %c0_13], %12 {strides = array<i32>} : memref<64x32xf32, #tpu.memory_space<vmem>>, vector<1x32xf32>,
    %c1_14 = arith.constant 1 : index
    %c1_15 = arith.constant 1 : index
    %14 = memref.load %arg1[%c1_14, %c1_15] : memref<2x8xi32, #tpu.memory_space<smem>>
    %15 = arith.index_cast %14 : i32 to index
    %c0_16 = arith.constant 0 : index
    %16 = vector.load %arg2[%15, %c0_16] : memref<128x32xf32, #tpu.memory_space<vmem>>, vector<1x32xf32>
    %c9 = arith.constant 9 : index
    %c0_17 = arith.constant 0 : index
    %17 = vector.load %arg4[%c9, %c0_17] : memref<64x32xf32, #tpu.memory_space<vmem>>, vector<1x32xf32>
    tpu.vector_store %arg4[%c9, %c0_17], %16 {strides = array<i32>} : memref<64x32xf32, #tpu.memory_space<vmem>>, vector<1x32xf32>,
    %c0_18 = arith.constant 0 : index
    %c2 = arith.constant 2 : index
    %18 = memref.load %arg1[%c0_18, %c2] : memref<2x8xi32, #tpu.memory_space<smem>>
    %19 = arith.index_cast %18 : i32 to index
    %c0_19 = arith.constant 0 : index
    %20 = vector.load %arg2[%19, %c0_19] : memref<128x32xf32, #tpu.memory_space<vmem>>, vector<1x32xf32>
    %c16 = arith.constant 16 : index
    %c0_20 = arith.constant 0 : index
    %21 = vector.load %arg4[%c16, %c0_20] : memref<64x32xf32, #tpu.memory_space<vmem>>, vector<1x32xf32>
    tpu.vector_store %arg4[%c16, %c0_20], %20 {strides = array<i32>} : memref<64x32xf32, #tpu.memory_space<vmem>>, vector<1x32xf32>,
    %c1_21 = arith.constant 1 : index
    %c2_22 = arith.constant 2 : index
    %22 = memref.load %arg1[%c1_21, %c2_22] : memref<2x8xi32, #tpu.memory_space<smem>>
    %23 = arith.index_cast %22 : i32 to index
    %c0_23 = arith.constant 0 : index
    %24 = vector.load %arg2[%23, %c0_23] : memref<128x32xf32, #tpu.memory_space<vmem>>, vector<1x32xf32>
    %c17 = arith.constant 17 : index
    %c0_24 = arith.constant 0 : index
    %25 = vector.load %arg4[%c17, %c0_24] : memref<64x32xf32, #tpu.memory_space<vmem>>, vector<1x32xf32>
    tpu.vector_store %arg4[%c17, %c0_24], %24 {strides = array<i32>} : memref<64x32xf32, #tpu.memory_space<vmem>>, vector<1x32xf32>,
    %c0_25 = arith.constant 0 : index
    %c3 = arith.constant 3 : index
    %26 = memref.load %arg1[%c0_25, %c3] : memref<2x8xi32, #tpu.memory_space<smem>>
    %27 = arith.index_cast %26 : i32 to index
    %c0_26 = arith.constant 0 : index
    %28 = vector.load %arg2[%27, %c0_26] : memref<128x32xf32, #tpu.memory_space<vmem>>, vector<1x32xf32>
    %c24 = arith.constant 24 : index
    %c0_27 = arith.constant 0 : index
    %29 = vector.load %arg4[%c24, %c0_27] : memref<64x32xf32, #tpu.memory_space<vmem>>, vector<1x32xf32>
    tpu.vector_store %arg4[%c24, %c0_27], %28 {strides = array<i32>} : memref<64x32xf32, #tpu.memory_space<vmem>>, vector<1x32xf32>,
    %c1_28 = arith.constant 1 : index
    %c3_29 = arith.constant 3 : index
    %30 = memref.load %arg1[%c1_28, %c3_29] : memref<2x8xi32, #tpu.memory_space<smem>>
    %31 = arith.index_cast %30 : i32 to index
    %c0_30 = arith.constant 0 : index
    %32 = vector.load %arg2[%31, %c0_30] : memref<128x32xf32, #tpu.memory_space<vmem>>, vector<1x32xf32>
    %c25 = arith.constant 25 : index
    %c0_31 = arith.constant 0 : index
    %33 = vector.load %arg4[%c25, %c0_31] : memref<64x32xf32, #tpu.memory_space<vmem>>, vector<1x32xf32>
    tpu.vector_store %arg4[%c25, %c0_31], %32 {strides = array<i32>} : memref<64x32xf32, #tpu.memory_space<vmem>>, vector<1x32xf32>,
    %c0_32 = arith.constant 0 : index
    %c4 = arith.constant 4 : index
    %34 = memref.load %arg1[%c0_32, %c4] : memref<2x8xi32, #tpu.memory_space<smem>>
    %35 = arith.index_cast %34 : i32 to index
    %c0_33 = arith.constant 0 : index
    %36 = vector.load %arg2[%35, %c0_33] : memref<128x32xf32, #tpu.memory_space<vmem>>, vector<1x32xf32>
    %c32 = arith.constant 32 : index
    %c0_34 = arith.constant 0 : index
    %37 = vector.load %arg4[%c32, %c0_34] : memref<64x32xf32, #tpu.memory_space<vmem>>, vector<1x32xf32>
    tpu.vector_store %arg4[%c32, %c0_34], %36 {strides = array<i32>} : memref<64x32xf32, #tpu.memory_space<vmem>>, vector<1x32xf32>,
    %c1_35 = arith.constant 1 : index
    %c4_36 = arith.constant 4 : index
    %38 = memref.load %arg1[%c1_35, %c4_36] : memref<2x8xi32, #tpu.memory_space<smem>>
    %39 = arith.index_cast %38 : i32 to index
    %c0_37 = arith.constant 0 : index
    %40 = vector.load %arg2[%39, %c0_37] : memref<128x32xf32, #tpu.memory_space<vmem>>, vector<1x32xf32>
    %c33 = arith.constant 33 : index
    %c0_38 = arith.constant 0 : index
    %41 = vector.load %arg4[%c33, %c0_38] : memref<64x32xf32, #tpu.memory_space<vmem>>, vector<1x32xf32>
    tpu.vector_store %arg4[%c33, %c0_38], %40 {strides = array<i32>} : memref<64x32xf32, #tpu.memory_space<vmem>>, vector<1x32xf32>,
    %c0_39 = arith.constant 0 : index
    %c5 = arith.constant 5 : index
    %42 = memref.load %arg1[%c0_39, %c5] : memref<2x8xi32, #tpu.memory_space<smem>>
    %43 = arith.index_cast %42 : i32 to index
    %c0_40 = arith.constant 0 : index
    %44 = vector.load %arg2[%43, %c0_40] : memref<128x32xf32, #tpu.memory_space<vmem>>, vector<1x32xf32>
    %c40 = arith.constant 40 : index
    %c0_41 = arith.constant 0 : index
    %45 = vector.load %arg4[%c40, %c0_41] : memref<64x32xf32, #tpu.memory_space<vmem>>, vector<1x32xf32>
    tpu.vector_store %arg4[%c40, %c0_41], %44 {strides = array<i32>} : memref<64x32xf32, #tpu.memory_space<vmem>>, vector<1x32xf32>,
    %c1_42 = arith.constant 1 : index
    %c5_43 = arith.constant 5 : index
    %46 = memref.load %arg1[%c1_42, %c5_43] : memref<2x8xi32, #tpu.memory_space<smem>>
    %47 = arith.index_cast %46 : i32 to index
    %c0_44 = arith.constant 0 : index
    %48 = vector.load %arg2[%47, %c0_44] : memref<128x32xf32, #tpu.memory_space<vmem>>, vector<1x32xf32>
    %c41 = arith.constant 41 : index
    %c0_45 = arith.constant 0 : index
    %49 = vector.load %arg4[%c41, %c0_45] : memref<64x32xf32, #tpu.memory_space<vmem>>, vector<1x32xf32>
    tpu.vector_store %arg4[%c41, %c0_45], %48 {strides = array<i32>} : memref<64x32xf32, #tpu.memory_space<vmem>>, vector<1x32xf32>,
    %c0_46 = arith.constant 0 : index
    %c6 = arith.constant 6 : index
    %50 = memref.load %arg1[%c0_46, %c6] : memref<2x8xi32, #tpu.memory_space<smem>>
    %51 = arith.index_cast %50 : i32 to index
    %c0_47 = arith.constant 0 : index
    %52 = vector.load %arg2[%51, %c0_47] : memref<128x32xf32, #tpu.memory_space<vmem>>, vector<1x32xf32>
    %c48 = arith.constant 48 : index
    %c0_48 = arith.constant 0 : index
    %53 = vector.load %arg4[%c48, %c0_48] : memref<64x32xf32, #tpu.memory_space<vmem>>, vector<1x32xf32>
    tpu.vector_store %arg4[%c48, %c0_48], %52 {strides = array<i32>} : memref<64x32xf32, #tpu.memory_space<vmem>>, vector<1x32xf32>,
    %c1_49 = arith.constant 1 : index
    %c6_50 = arith.constant 6 : index
    %54 = memref.load %arg1[%c1_49, %c6_50] : memref<2x8xi32, #tpu.memory_space<smem>>
    %55 = arith.index_cast %54 : i32 to index
    %c0_51 = arith.constant 0 : index
    %56 = vector.load %arg2[%55, %c0_51] : memref<128x32xf32, #tpu.memory_space<vmem>>, vector<1x32xf32>
    %c49 = arith.constant 49 : index
    %c0_52 = arith.constant 0 : index
    %57 = vector.load %arg4[%c49, %c0_52] : memref<64x32xf32, #tpu.memory_space<vmem>>, vector<1x32xf32>
    tpu.vector_store %arg4[%c49, %c0_52], %56 {strides = array<i32>} : memref<64x32xf32, #tpu.memory_space<vmem>>, vector<1x32xf32>,
    %c0_53 = arith.constant 0 : index
    %c7 = arith.constant 7 : index
    %58 = memref.load %arg1[%c0_53, %c7] : memref<2x8xi32, #tpu.memory_space<smem>>
    %59 = arith.index_cast %58 : i32 to index
    %c0_54 = arith.constant 0 : index
    %60 = vector.load %arg2[%59, %c0_54] : memref<128x32xf32, #tpu.memory_space<vmem>>, vector<1x32xf32>
    %c56 = arith.constant 56 : index
    %c0_55 = arith.constant 0 : index
    %61 = vector.load %arg4[%c56, %c0_55] : memref<64x32xf32, #tpu.memory_space<vmem>>, vector<1x32xf32>
    tpu.vector_store %arg4[%c56, %c0_55], %60 {strides = array<i32>} : memref<64x32xf32, #tpu.memory_space<vmem>>, vector<1x32xf32>,
    %c1_56 = arith.constant 1 : index
    %c7_57 = arith.constant 7 : index
    %62 = memref.load %arg1[%c1_56, %c7_57] : memref<2x8xi32, #tpu.memory_space<smem>>
    %63 = arith.index_cast %62 : i32 to index
    %c0_58 = arith.constant 0 : index
    %64 = vector.load %arg2[%63, %c0_58] : memref<128x32xf32, #tpu.memory_space<vmem>>, vector<1x32xf32>
    %c57 = arith.constant 57 : index
    %c0_59 = arith.constant 0 : index
    %65 = vector.load %arg4[%c57, %c0_59] : memref<64x32xf32, #tpu.memory_space<vmem>>, vector<1x32xf32>
    tpu.vector_store %arg4[%c57, %c0_59], %64 {strides = array<i32>} : memref<64x32xf32, #tpu.memory_space<vmem>>, vector<1x32xf32>,
    %c56_60 = arith.constant 56 : index
    %c0_61 = arith.constant 0 : index
    %66 = vector.load %arg2[%c56_60, %c0_61] : memref<128x32xf32, #tpu.memory_space<vmem>>, vector<32x32xf32>
    %cst_62 = arith.constant 0.000000e+00 : f32
    %67 = vector.broadcast %cst_62 : f32 to vector<8x32xf32>
    %c56_63 = arith.constant 56 : index
    %c0_64 = arith.constant 0 : index
    %68 = vector.load %arg4[%c56_63, %c0_64] : memref<64x32xf32, #tpu.memory_space<vmem>>, vector<8x32xf32>
    %cst_65 = arith.constant dense<0.000000e+00> : vector<8x32xf32>
    %69 = tpu.matmul %67, %66, %cst_65 {dimension_numbers = #tpu.dot_dimension_numbers<[1], [0], [0], [1], [0, 0, 1, 1], [], []>} : vector<8x32xf32>, vector<32x32xf32>, vector<8x32xf32> -> vector<8x32xf32>
    %70 = arith.addf %68, %69 : vector<8x32xf32>
    %71 = math.tanh %70 : vector<8x32xf32>
    %c48_66 = arith.constant 48 : index
    %c0_67 = arith.constant 0 : index
    %72 = vector.load %arg4[%c48_66, %c0_67] : memref<64x32xf32, #tpu.memory_space<vmem>>, vector<8x32xf32>
    %cst_68 = arith.constant dense<0.000000e+00> : vector<8x32xf32>
    %73 = tpu.matmul %71, %66, %cst_68 {dimension_numbers = #tpu.dot_dimension_numbers<[1], [0], [0], [1], [0, 0, 1, 1], [], []>} : vector<8x32xf32>, vector<32x32xf32>, vector<8x32xf32> -> vector<8x32xf32>
    %74 = arith.addf %72, %73 : vector<8x32xf32>
    %75 = math.tanh %74 : vector<8x32xf32>
    %c40_69 = arith.constant 40 : index
    %c0_70 = arith.constant 0 : index
    %76 = vector.load %arg4[%c40_69, %c0_70] : memref<64x32xf32, #tpu.memory_space<vmem>>, vector<8x32xf32>
    %cst_71 = arith.constant dense<0.000000e+00> : vector<8x32xf32>
    %77 = tpu.matmul %75, %66, %cst_71 {dimension_numbers = #tpu.dot_dimension_numbers<[1], [0], [0], [1], [0, 0, 1, 1], [], []>} : vector<8x32xf32>, vector<32x32xf32>, vector<8x32xf32> -> vector<8x32xf32>
    %78 = arith.addf %76, %77 : vector<8x32xf32>
    %79 = math.tanh %78 : vector<8x32xf32>
    %c32_72 = arith.constant 32 : index
    %c0_73 = arith.constant 0 : index
    %80 = vector.load %arg4[%c32_72, %c0_73] : memref<64x32xf32, #tpu.memory_space<vmem>>, vector<8x32xf32>
    %cst_74 = arith.constant dense<0.000000e+00> : vector<8x32xf32>
    %81 = tpu.matmul %79, %66, %cst_74 {dimension_numbers = #tpu.dot_dimension_numbers<[1], [0], [0], [1], [0, 0, 1, 1], [], []>} : vector<8x32xf32>, vector<32x32xf32>, vector<8x32xf32> -> vector<8x32xf32>
    %82 = arith.addf %80, %81 : vector<8x32xf32>
    %83 = math.tanh %82 : vector<8x32xf32>
    %c24_75 = arith.constant 24 : index
    %c0_76 = arith.constant 0 : index
    %84 = vector.load %arg4[%c24_75, %c0_76] : memref<64x32xf32, #tpu.memory_space<vmem>>, vector<8x32xf32>
    %cst_77 = arith.constant dense<0.000000e+00> : vector<8x32xf32>
    %85 = tpu.matmul %83, %66, %cst_77 {dimension_numbers = #tpu.dot_dimension_numbers<[1], [0], [0], [1], [0, 0, 1, 1], [], []>} : vector<8x32xf32>, vector<32x32xf32>, vector<8x32xf32> -> vector<8x32xf32>
    %86 = arith.addf %84, %85 : vector<8x32xf32>
    %87 = math.tanh %86 : vector<8x32xf32>
    %c16_78 = arith.constant 16 : index
    %c0_79 = arith.constant 0 : index
    %88 = vector.load %arg4[%c16_78, %c0_79] : memref<64x32xf32, #tpu.memory_space<vmem>>, vector<8x32xf32>
    %cst_80 = arith.constant dense<0.000000e+00> : vector<8x32xf32>
    %89 = tpu.matmul %87, %66, %cst_80 {dimension_numbers = #tpu.dot_dimension_numbers<[1], [0], [0], [1], [0, 0, 1, 1], [], []>} : vector<8x32xf32>, vector<32x32xf32>, vector<8x32xf32> -> vector<8x32xf32>
    %90 = arith.addf %88, %89 : vector<8x32xf32>
    %91 = math.tanh %90 : vector<8x32xf32>
    %c8_81 = arith.constant 8 : index
    %c0_82 = arith.constant 0 : index
    %92 = vector.load %arg4[%c8_81, %c0_82] : memref<64x32xf32, #tpu.memory_space<vmem>>, vector<8x32xf32>
    %cst_83 = arith.constant dense<0.000000e+00> : vector<8x32xf32>
    %93 = tpu.matmul %91, %66, %cst_83 {dimension_numbers = #tpu.dot_dimension_numbers<[1], [0], [0], [1], [0, 0, 1, 1], [], []>} : vector<8x32xf32>, vector<32x32xf32>, vector<8x32xf32> -> vector<8x32xf32>
    %94 = arith.addf %92, %93 : vector<8x32xf32>
    %95 = math.tanh %94 : vector<8x32xf32>
    %c0_84 = arith.constant 0 : index
    %c0_85 = arith.constant 0 : index
    %96 = vector.load %arg4[%c0_84, %c0_85] : memref<64x32xf32, #tpu.memory_space<vmem>>, vector<8x32xf32>
    %cst_86 = arith.constant dense<0.000000e+00> : vector<8x32xf32>
    %97 = tpu.matmul %95, %66, %cst_86 {dimension_numbers = #tpu.dot_dimension_numbers<[1], [0], [0], [1], [0, 0, 1, 1], [], []>} : vector<8x32xf32>, vector<32x32xf32>, vector<8x32xf32> -> vector<8x32xf32>
    %98 = arith.addf %96, %97 : vector<8x32xf32>
    %99 = math.tanh %98 : vector<8x32xf32>
    %c88 = arith.constant 88 : index
    %c0_87 = arith.constant 0 : index
    %100 = vector.load %arg2[%c88, %c0_87] : memref<128x32xf32, #tpu.memory_space<vmem>>, vector<32x32xf32>
    %c120 = arith.constant 120 : index
    %c0_88 = arith.constant 0 : index
    %101 = vector.load %arg2[%c120, %c0_88] : memref<128x32xf32, #tpu.memory_space<vmem>>, vector<1x32xf32>
    %cst_89 = arith.constant dense<0.000000e+00> : vector<8x32xf32>
    %102 = tpu.matmul %99, %100, %cst_89 {dimension_numbers = #tpu.dot_dimension_numbers<[1], [0], [0], [1], [0, 0, 1, 1], [], []>} : vector<8x32xf32>, vector<32x32xf32>, vector<8x32xf32> -> vector<8x32xf32>
    %103 = vector.broadcast %101 : vector<1x32xf32> to vector<8x32xf32>
    %104 = arith.addf %102, %103 : vector<8x32xf32>
    %cst_90 = arith.constant dense<0xFF800000> : vector<8xf32>
    %105 = vector.multi_reduction <maximumf>, %104, %cst_90 [1] : vector<8x32xf32> to vector<8xf32>
    %106 = vector.shape_cast %105 : vector<8xf32> to vector<8x1xf32>
    %107 = vector.broadcast %106 : vector<8x1xf32> to vector<8x32xf32>
    %108 = arith.subf %104, %107 : vector<8x32xf32>
    %109 = math.exp %108 : vector<8x32xf32>
    %cst_91 = arith.constant dense<0.000000e+00> : vector<8xf32>
    %110 = vector.multi_reduction <add>, %109, %cst_91 [1] : vector<8x32xf32> to vector<8xf32>
    %111 = vector.shape_cast %110 : vector<8xf32> to vector<8x1xf32>
    %112 = vector.broadcast %111 : vector<8x1xf32> to vector<8x32xf32>
    %113 = arith.divf %109, %112 : vector<8x32xf32>
    %114 = vector.extract_strided_slice %113 {offsets = [0, 0], sizes = [2, 8], strides = [1, 1]} : vector<8x32xf32> to vector<2x8xf32>
    %c0_92 = arith.constant 0 : index
    %c0_93 = arith.constant 0 : index
    %115 = vector.load %arg3[%c0_92, %c0_93] : memref<2x8xf32, #tpu.memory_space<vmem>>, vector<2x8xf32>
    tpu.vector_store %arg3[%c0_92, %c0_93], %114 {strides = array<i32>} : memref<2x8xf32, #tpu.memory_space<vmem>>, vector<2x8xf32>,
    return
  }
  func.func @transform_0(%arg0: i32, %arg1: memref<2x8xi32, #tpu.memory_space<smem>>) -> (i32, i32) {
    %c0_i32 = arith.constant 0 : i32
    %c0_i32_0 = arith.constant 0 : i32
    %c0_i32_1 = arith.constant 0 : i32
    return %c0_i32, %c0_i32_0 : i32, i32
  }
  func.func @transform_1(%arg0: i32, %arg1: memref<2x8xi32, #tpu.memory_space<smem>>) -> (i32, i32) {
    %c0_i32 = arith.constant 0 : i32
    %c0_i32_0 = arith.constant 0 : i32
    %c0_i32_1 = arith.constant 0 : i32
    return %c0_i32, %c0_i32_0 : i32, i32
  }
}

</mosaic_0001>

<bundles_post_ra>
// kernel: tpu_custom_call.1
= control target key start
LH: loop header
LB: loop body
LE: loop exit
PB: predicated region body
PF: predicated region fallthrough
CT: control target
= control target key end

     0   :  { %s478_s12 = smov [#allocation4]   ;;  %s614_s0 = inlined_call_operand.vmem [shape: s32[2,8], index: 0, kind: input, shape index: {}]   ;;  %s615_s1 = inlined_call_operand.vmem [shape: f32[128,32], index: 1, kind: input, shape index: {}]   ;;  %s616_s2 = inlined_call_operand.hbm [shape: f32[2,8], index: 2, kind: output, shape index: {}]  }
   0x1   :  { %s8_s11 = sshll.u32 %s614_s0, 4  ;;  %s9_s11 = int_to_ptr.vmem [resolvable:$true] %s8_s11 }
   0x2   :  { %11 = dma.vmem_to_smem %s9_s11, 32, %s478_s12, [#allocation3] }
   0x3   :  { %474 = dma.done.wait [#allocation3], 32 }
   0x4   :  { %475 = vsyncadd [#allocation3], 4294967264 }
   0x5   :  { %14 = sfence }
   0x6   :  { %v95_v0 = vld [vmem:[%s615_s1 + $0x50] sm:$0xff]  ;;  %v94_v1 = vld [vmem:[%s615_s1 + $0x48] sm:$0xff]  ;;  %vm18_vm0 = vcmask 261120   ;;  %v479_v2 = vmov 0.0   ;;  %s404_s0 = sld [smem:[#allocation4 + $0x7]]  ;;  %v93_v3 = vld [vmem:[%s615_s1 + $0x40] sm:$0xff] }
   0x7   :  { %112 = vmatpush.msra.mxu0 %v95_v0  ;;  %26 = vst.msk [vmem:[#allocation2 + $0x38] sm:$0xff] %vm18_vm0, %v479_v2  ;;  %138 = vmatpush.msra.mxu1 %v95_v0  ;;  %s509_s19 = sld [smem:[#allocation4 + $0x87]] }
   0x8   :  { %19 = vst.msk [vmem:[#allocation2] sm:$0xff] %vm18_vm0, %v479_v2  ;;  %164 = vmatpush.msra.mxu2 %v95_v0  ;;  %190 = vmatpush.msra.mxu3 %v95_v0 }
   0x9   :  { %15 = vsyncpa [#allocation6], 0  ;;  %113 = vmatpush.msra.mxu0 %v94_v1  ;;  %20 = vst.msk [vmem:[#allocation2 + $0x8] sm:$0xff] %vm18_vm0, %v479_v2  ;;  %139 = vmatpush.msra.mxu1 %v94_v1  ;;  %v92_v4 = vld [vmem:[%s615_s1 + $0x38] sm:$0xff]  ;;  %vm30_vm1 = vcmask 253952   ;;  %s402_s28 = sld [smem:[#allocation4 + $0x6]] }
   0xa   :  { %21 = vst.msk [vmem:[#allocation2 + $0x10] sm:$0xff] %vm18_vm0, %v479_v2  ;;  %165 = vmatpush.msra.mxu2 %v94_v1  ;;  %191 = vmatpush.msra.mxu3 %v94_v1  ;;  %s403_s29 = sld [smem:[#allocation4 + $0x86]]  ;;  %v307_v49 = vld [vmem:[%s615_s1 + $0x70] sm:$0xff]  ;;  %v306_v50 = vld [vmem:[%s615_s1 + $0x68] sm:$0xff]  ;;  %v305_v51 = vld [vmem:[%s615_s1 + $0x60] sm:$0xff]  ;;  %vm357_vm6 = vcmask 58368  }
   0xb   :  { %114 = vmatpush.msra.mxu0 %v93_v3  ;;  %22 = vst.msk [vmem:[#allocation2 + $0x18] sm:$0xff] %vm18_vm0, %v479_v2  ;;  %140 = vmatpush.msra.mxu1 %v93_v3  ;;  %s400_s8 = sld [smem:[#allocation4 + $0x5]]  ;;  %v304_v52 = vld [vmem:[%s615_s1 + $0x58] sm:$0xff] }
   0xc   :  { %23 = vst.msk [vmem:[#allocation2 + $0x20] sm:$0xff] %vm18_vm0, %v479_v2  ;;  %166 = vmatpush.msra.mxu2 %v93_v3  ;;  %192 = vmatpush.msra.mxu3 %v93_v3  ;;  %s85_s24 = scalar_lea.vmem %s615_s1, %s404_s0  ;;  %s401_s9 = sld [smem:[#allocation4 + $0x85]]  ;;  %v417_v57 = vld [vmem:[%s615_s1 + $0x78] ss:$0 sm:$0xff] }
   0xd   :  { %115 = vmatpush.msra.mxu0 %v92_v4  ;;  %24 = vst.msk [vmem:[#allocation2 + $0x28] sm:$0xff] %vm18_vm0, %v479_v2  ;;  %141 = vmatpush.msra.mxu1 %v92_v4  ;;  %v86_v5 = vld [vmem:[%s85_s24] sm:$0x1]  ;;  %s89_s27 = scalar_lea.vmem %s615_s1, %s509_s19  ;;  %s398_s16 = sld [smem:[#allocation4 + $0x4]] }
   0xe   :  { %116 = vmatmul.f32.vlgmr.msra.gmra.mxu0 %v479_v2  ;;  %25 = vst.msk [vmem:[#allocation2 + $0x30] sm:$0xff] %vm18_vm0, %v479_v2  ;;  %167 = vmatpush.msra.mxu2 %v92_v4  ;;  %v90_v6 = vld [vmem:[%s89_s27] sm:$0x1]  ;;  %s399_s0 = sld [smem:[#allocation4 + $0x84]] }
   0xf   :  { %87 = vst.msk [vmem:[#allocation2 + $0x38] sm:$0x1] %vm30_vm1, %v86_v5  ;;  %193 = vmatpush.msra.mxu3 %v92_v4  ;;  %216 = vmatpush.msrb.mxu0 %v95_v0  ;;  %s77_s4 = scalar_lea.vmem %s615_s1, %s402_s28  ;;  %s396_s23 = sld [smem:[#allocation4 + $0x3]] }
  0x10   :  { %91 = vst.msk [vmem:[#allocation2 + $0x39] sm:$0x1] %vm30_vm1, %v90_v6  ;;  %242 = vmatpush.msrb.mxu1 %v95_v0  ;;  %268 = vmatpush.msrb.mxu2 %v95_v0  ;;  %s81_s7 = scalar_lea.vmem %s615_s1, %s403_s29  ;;  %v78_v7 = vld [vmem:[%s77_s4] sm:$0x1]  ;;  %s397_s24 = sld [smem:[#allocation4 + $0x83]] }
  0x11   :  { %217 = vmatpush.msrb.mxu0 %v94_v1  ;;  %294 = vmatpush.msrb.mxu3 %v95_v0  ;;  %v82_v8 = vld [vmem:[%s81_s7] sm:$0x1]  ;;  %79 = vst.msk [vmem:[#allocation2 + $0x30] sm:$0x1] %vm30_vm1, %v78_v7  ;;  %s69_s12 = scalar_lea.vmem %s615_s1, %s400_s8  ;;  %s394_s3 = sld [smem:[#allocation4 + $0x2]] }
  0x12   :  { %243 = vmatpush.msrb.mxu1 %v94_v1  ;;  %269 = vmatpush.msrb.mxu2 %v94_v1  ;;  %83 = vst.msk [vmem:[#allocation2 + $0x31] sm:$0x1] %vm30_vm1, %v82_v8  ;;  %s73_s15 = scalar_lea.vmem %s615_s1, %s401_s9  ;;  %v70_v13 = vld [vmem:[%s69_s12] sm:$0x1]  ;;  %s395_s4 = sld [smem:[#allocation4 + $0x82]] }
  0x13   :  { %218 = vmatpush.msrb.mxu0 %v93_v3  ;;  %295 = vmatpush.msrb.mxu3 %v94_v1  ;;  %v74_v14 = vld [vmem:[%s73_s15] sm:$0x1]  ;;  %71 = vst.msk [vmem:[#allocation2 + $0x28] sm:$0x1] %vm30_vm1, %v70_v13  ;;  %s61_s19 = scalar_lea.vmem %s615_s1, %s398_s16  ;;  %s392_s11 = sld [smem:[#allocation4 + $0x1]] }
  0x14   :  { %244 = vmatpush.msrb.mxu1 %v93_v3  ;;  %270 = vmatpush.msrb.mxu2 %v93_v3  ;;  %75 = vst.msk [vmem:[#allocation2 + $0x29] sm:$0x1] %vm30_vm1, %v74_v14  ;;  %s65_s22 = scalar_lea.vmem %s615_s1, %s399_s0  ;;  %v62_v19 = vld [vmem:[%s61_s19] sm:$0x1]  ;;  %s393_s12 = sld [smem:[#allocation4 + $0x81]] }
  0x15   :  { %219 = vmatpush.msrb.mxu0 %v92_v4  ;;  %296 = vmatpush.msrb.mxu3 %v93_v3  ;;  %v66_v20 = vld [vmem:[%s65_s22] sm:$0x1]  ;;  %63 = vst.msk [vmem:[#allocation2 + $0x20] sm:$0x1] %vm30_vm1, %v62_v19  ;;  %s53_s27 = scalar_lea.vmem %s615_s1, %s396_s23  ;;  %s27_s18 = sld [smem:[#allocation4]] }
  0x16   :  { %245 = vmatpush.msrb.mxu1 %v92_v4  ;;  %271 = vmatpush.msrb.mxu2 %v92_v4  ;;  %67 = vst.msk [vmem:[#allocation2 + $0x21] sm:$0x1] %vm30_vm1, %v66_v20  ;;  %s57_s30 = scalar_lea.vmem %s615_s1, %s397_s24  ;;  %v54_v25 = vld [vmem:[%s53_s27] sm:$0x1]  ;;  %s391_s19 = sld [smem:[#allocation4 + $0x80]] }
  0x17   :  { %297 = vmatpush.msrb.mxu3 %v92_v4  ;;  %v96_v9 = vld [vmem:[#allocation2 + $0x38] sm:$0xff]  ;;  %v58_v26 = vld [vmem:[%s57_s30] sm:$0x1]  ;;  %55 = vst.msk [vmem:[#allocation2 + $0x18] sm:$0x1] %vm30_vm1, %v54_v25  ;;  %s45_s7 = scalar_lea.vmem %s615_s1, %s394_s3  ;;  %325 = vmatpush.msra.mxu0 %v307_v49 }
  0x18   :  { %59 = vst.msk [vmem:[#allocation2 + $0x19] sm:$0x1] %vm30_vm1, %v58_v26  ;;  %s49_s10 = scalar_lea.vmem %s615_s1, %s395_s4  ;;  %v46_v31 = vld [vmem:[%s45_s7] sm:$0x1] }
  0x19   :  { %v122_v15 = vld [vmem:[#allocation2 + $0x30] sm:$0xff]  ;;  %v50_v32 = vld [vmem:[%s49_s10] sm:$0x1]  ;;  %47 = vst.msk [vmem:[#allocation2 + $0x10] sm:$0x1] %vm30_vm1, %v46_v31  ;;  %s37_s15 = scalar_lea.vmem %s615_s1, %s392_s11  ;;  %326 = vmatpush.msra.mxu0 %v306_v50  ;;  %s366_s11 = sshll.u32 %s616_s2, 4  ;;  %s367_s11 = int_to_ptr.hbm [resolvable:$true] %s366_s11 }
  0x1a   :  { %51 = vst.msk [vmem:[#allocation2 + $0x11] sm:$0x1] %vm30_vm1, %v50_v32  ;;  %s41_s17 = scalar_lea.vmem %s615_s1, %s393_s12  ;;  %v38_v37 = vld [vmem:[%s37_s15] sm:$0x1] }
  0x1b   :  { %v148_v21 = vld [vmem:[#allocation2 + $0x28] sm:$0xff]  ;;  %v42_v38 = vld [vmem:[%s41_s17] sm:$0x1]  ;;  %39 = vst.msk [vmem:[#allocation2 + $0x8] sm:$0x1] %vm30_vm1, %v38_v37  ;;  %s28_s22 = scalar_lea.vmem %s615_s1, %s27_s18  ;;  %327 = vmatpush.msra.mxu0 %v305_v51 }
  0x1c   :  { %43 = vst.msk [vmem:[#allocation2 + $0x9] sm:$0x1] %vm30_vm1, %v42_v38  ;;  %s33_s25 = scalar_lea.vmem %s615_s1, %s391_s19  ;;  %v29_v43 = vld [vmem:[%s28_s22] sm:$0x1]  ;;  %s480_s1 = smov [#allocation5]  }
  0x1d   :  { %v174_v27 = vld [vmem:[#allocation2 + $0x20] sm:$0xff]  ;;  %31 = vst.msk [vmem:[#allocation2] sm:$0x1] %vm30_vm1, %v29_v43  ;;  %328 = vmatpush.msra.mxu0 %v304_v52  ;;  %s364_s8 = sshll.u32 %s480_s1, 4  ;;  %s365_s8 = int_to_ptr.vmem [resolvable:$true] %s364_s8 }
  0x1e   :  { %v34_v44 = vld [vmem:[%s33_s25] sm:$0x1] }
  0x1f   :  { %v200_v33 = vld [vmem:[#allocation2 + $0x18] sm:$0xff]  ;;  %35 = vst.msk [vmem:[#allocation2 + $0x1] sm:$0x1] %vm30_vm1, %v34_v44 }
  0x21   :  { %v226_v39 = vld [vmem:[#allocation2 + $0x10] sm:$0xff] }
  0x23   :  { %v252_v45 = vld [vmem:[#allocation2 + $0x8] sm:$0xff] }
  0x26   :  { %v278_v53 = vld [vmem:[#allocation2] sm:$0xff] }
  0x8b   :  { %v117_v10 = vpop.f32.mrf.mxu0 }
  0x8c   :  { %v120_v11 = vadd.f32 %v117_v10, %v96_v9 }
  0x8e   :  { %418 = vtanh.f32 %v120_v11 }
  0x94   :  { %v419_v12 = vpop.eup %418 }
  0x95   :  { %406 = vmatmul.msk.f32.vlgmr.msra.gmra.mxu1 %vm18_vm0, %v419_v12 }
 0x112   :  { %v143_v16 = vpop.f32.mrf.mxu1 }
 0x113   :  { %v146_v17 = vadd.f32 %v143_v16, %v122_v15 }
 0x115   :  { %420 = vtanh.f32 %v146_v17 }
 0x11b   :  { %v421_v18 = vpop.eup %420 }
 0x11c   :  { %407 = vmatmul.msk.f32.vlgmr.msra.gmra.mxu2 %vm18_vm0, %v421_v18 }
 0x19f   :  { %v169_v22 = vpop.f32.mrf.mxu2 }
 0x1a0   :  { %v172_v23 = vadd.f32 %v169_v22, %v148_v21 }
 0x1a2   :  { %422 = vtanh.f32 %v172_v23 }
 0x1a8   :  { %v423_v24 = vpop.eup %422 }
 0x1a9   :  { %408 = vmatmul.msk.f32.vlgmr.msra.gmra.mxu3 %vm18_vm0, %v423_v24 }
 0x22c   :  { %v195_v28 = vpop.f32.mrf.mxu3 }
 0x22d   :  { %v198_v29 = vadd.f32 %v195_v28, %v174_v27 }
 0x22f   :  { %424 = vtanh.f32 %v198_v29 }
 0x235   :  { %v425_v30 = vpop.eup %424 }
 0x236   :  { %409 = vmatmul.msk.f32.vlgmr.msrb.gmra.mxu0 %vm18_vm0, %v425_v30 }
 0x2b3   :  { %v221_v34 = vpop.f32.mrf.mxu0 }
 0x2b4   :  { %v224_v35 = vadd.f32 %v221_v34, %v200_v33 }
 0x2b6   :  { %426 = vtanh.f32 %v224_v35 }
 0x2bc   :  { %v427_v36 = vpop.eup %426 }
 0x2bd   :  { %410 = vmatmul.msk.f32.vlgmr.msrb.gmra.mxu1 %vm18_vm0, %v427_v36 }
 0x33a   :  { %v247_v40 = vpop.f32.mrf.mxu1 }
 0x33b   :  { %v250_v41 = vadd.f32 %v247_v40, %v226_v39 }
 0x33d   :  { %428 = vtanh.f32 %v250_v41 }
 0x343   :  { %v429_v42 = vpop.eup %428 }
 0x344   :  { %411 = vmatmul.msk.f32.vlgmr.msrb.gmra.mxu2 %vm18_vm0, %v429_v42 }
 0x3c7   :  { %v273_v46 = vpop.f32.mrf.mxu2 }
 0x3c8   :  { %v276_v47 = vadd.f32 %v273_v46, %v252_v45 }
 0x3ca   :  { %430 = vtanh.f32 %v276_v47 }
 0x3d0   :  { %v431_v48 = vpop.eup %430 }
 0x3d1   :  { %412 = vmatmul.msk.f32.vlgmr.msrb.gmra.mxu3 %vm18_vm0, %v431_v48 }
 0x454   :  { %v299_v54 = vpop.f32.mrf.mxu3 }
 0x455   :  { %v302_v55 = vadd.f32 %v299_v54, %v278_v53 }
 0x457   :  { %432 = vtanh.f32 %v302_v55 }
 0x45d   :  { %v433_v56 = vpop.eup %432 }
 0x45e   :  { %413 = vmatmul.msk.f32.vlgmr.msra.gmra.mxu0 %vm18_vm0, %v433_v56 }
 0x4db   :  { %v330_v58 = vpop.f32.mrf.mxu0 }
 0x4dc   :  { %v331_v59 = vadd.f32 %v417_v57, %v330_v58 }
 0x4de   :  { %v333_v60 = vsel %vm18_vm0, %v331_v59, -inf }
 0x4df   :  { %334 = vmax.xlane.f32.xlu0 %v333_v60 }
 0x552   :  { %v335_v61 = vpop.xlane.xlu0 %334 }
 0x553   :  { %v336_v62 = vsub.f32 %v331_v59, %v335_v61 }
 0x555   :  { %v337_v63 = vmul.f32 1.442695, %v336_v62 }
 0x557   :  { %434 = vpow2.f32 %v337_v63 }
 0x55d   :  { %v435_v0 = vpop.eup %434 }
 0x55e   :  { %v339_v1 = vsel %vm18_vm0, %v435_v0, 0.0 }
 0x55f   :  { %340 = vadd.xlane.f32.xlu0 %v339_v1 }
 0x5d2   :  { %v341_v2 = vpop.xlane.xlu0 %340 }
 0x5d3   :  { %436 = vrcp.f32 %v341_v2  ;;  %v353_v6 = vand.u32 2147483648, %v341_v2  ;;  %v351_v8 = vand.u32 2147483647, %v341_v2  ;;  %vm347_vm3 = vweird.f32 %v341_v2 }
 0x5d5   :  { %v354_v10 = vor.u32 1.1754944e-38, %v353_v6  ;;  %vm352_vm5 = vcmp.eq.f32.partialorder %v351_v8, 8.507059e+37 }
 0x5d9   :  { %v437_v3 = vpop.eup %436 }
 0x5da   :  { %v343_v4 = vmul.f32 %v437_v3, %v341_v2  ;;  %vm348_vm2 = vweird.f32 %v437_v3 }
 0x5db   :  { %vm349_vm4 = vmor %vm347_vm3, %vm348_vm2 }
 0x5dc   :  { %v344_v5 = vsub.f32 1.0, %v343_v4 }
 0x5de   :  { %v345_v7 = vmul.f32 %v437_v3, %v344_v5 }
 0x5e0   :  { %v346_v9 = vadd.f32 %v437_v3, %v345_v7 }
 0x5e2   :  { %v350_v11 = vsel %vm349_vm4, %v437_v3, %v346_v9 }
 0x5e3   :  { %v355_v12 = vsel %vm352_vm5, %v354_v10, %v350_v11 }
 0x5e4   :  { %v356_v13 = vmul.f32 %v435_v0, %v355_v12 }
 0x5e6   :  { %358 = vst.msk [vmem:[#allocation5] sm:$0x3] %vm357_vm6, %v356_v13 }
 0x5e7   :  { %369 = dma.vmem_to_hbm [thread:$0]  %s365_s8, 32, %s367_s11, [#allocation6]  }
 0x5e8   :  { %476 = dma.done.wait [#allocation6], 32  }
 0x5e9   :  { %477 = vsyncadd [#allocation6], 4294967264 }
 0x5ea   :  { %374 = vsyncpa [#allocation6], 1 }

</bundles_post_ra>
